<compile_context>
chip_gen: v7x
topology: tpu7x:2x2x1
jax: 0.10.0
libtpu: 0.0.40
codegen_flags: <defaults>
</compile_context>

<pallas_src>
import functools
import math

import jax
import jax.numpy as jnp
from jax import lax
from jax.experimental import pallas as pl
from jax.experimental.pallas import tpu as pltpu

_HIDDEN = 256
_FWD_OUT = 288            # ForwardNetwork.num_outputs (hardcoded in the torch module)


def _round_up(x, m):
    return ((x + m - 1) // m) * m


# ----------------------------------------------------------------------------
# Fused kernel: both attention-gated MLP branches in one body.
# ----------------------------------------------------------------------------
def _icm_kernel(cf_ref, nf_ref, act_ref,
                wfa_ref, bfa_ref, wf1_ref, bf1_ref, wf2_ref, bf2_ref,
                wba_ref, bba_ref, wb1_ref, bb1_ref, wb2_ref, bb2_ref,
                nfp_ref, ap_ref, *, num_features, action_space):
    f32 = jnp.float32
    bf16 = jnp.bfloat16
    F = num_features
    A = action_space

    cf = cf_ref[...]                       # (BT, F)  f32
    nf = nf_ref[...]                       # (BT, F)  f32
    act = act_ref[...]                     # (BT, 1)  int32
    bt = cf.shape[0]

    # one-hot built in-kernel (VPU compare) -- no HBM one_hot, no concat DMA.
    one_hot = (lax.broadcasted_iota(jnp.int32, (bt, A), 1) == act).astype(f32)

    # single bf16 cast of each activation operand, reused across matmuls
    cf_b = cf.astype(bf16)
    nf_b = nf.astype(bf16)
    oh_b = one_hot.astype(bf16)

    def softmax_gate(logits):                       # f32 in, f32 out
        m = jnp.max(logits, axis=-1, keepdims=True)
        e = jnp.exp(logits - m)
        # divide on the EUP (approx reciprocal) instead of the VALU
        return e * pl.reciprocal(jnp.sum(e, axis=-1, keepdims=True), approx=True)

    # ------------------- forward branch ------------------------------------
    # attention over concat([cf, one_hot]) expressed as split matmuls
    logits_f = (jnp.dot(cf_b, wfa_ref[:F, :], preferred_element_type=f32)
                + jnp.dot(oh_b, wfa_ref[F:, :], preferred_element_type=f32)
                + bfa_ref[...])                                   # (BT, F+A)
    attn_f = softmax_gate(logits_f)
    g_cf = (cf * attn_f[:, :F]).astype(bf16)
    g_oh = (one_hot * attn_f[:, F:]).astype(bf16)
    h_f = (jnp.dot(g_cf, wf1_ref[:F, :], preferred_element_type=f32)
           + jnp.dot(g_oh, wf1_ref[F:, :], preferred_element_type=f32)
           + bf1_ref[...])                                        # (BT, 256)
    nfp = jnp.dot(h_f.astype(bf16), wf2_ref[...],
                  preferred_element_type=f32) + bf2_ref[...]      # (BT, 384)
    nfp_ref[...] = nfp.astype(nfp_ref.dtype)

    # ------------------- backward branch ------------------------------------
    # attention over concat([cf, nf]) expressed as split matmuls
    logits_b = (jnp.dot(cf_b, wba_ref[:F, :], preferred_element_type=f32)
                + jnp.dot(nf_b, wba_ref[F:, :], preferred_element_type=f32)
                + bba_ref[...])                                   # (BT, 2F)
    attn_b = softmax_gate(logits_b)
    g_cf2 = (cf * attn_b[:, :F]).astype(bf16)
    g_nf = (nf * attn_b[:, F:]).astype(bf16)
    h_b = (jnp.dot(g_cf2, wb1_ref[:F, :], preferred_element_type=f32)
           + jnp.dot(g_nf, wb1_ref[F:, :], preferred_element_type=f32)
           + bb1_ref[...])                                        # (BT, 256)
    ap = jnp.dot(h_b.astype(bf16), wb2_ref[...],
                 preferred_element_type=f32) + bb2_ref[...]       # (BT, 128)
    ap_ref[...] = ap.astype(ap_ref.dtype)


# ----------------------------------------------------------------------------
# Parameter construction (PyTorch nn.Linear-style init, kept in f32 for the
# reference) and kernel-side parameter prep (bf16 weights, lane-padded heads).
# ----------------------------------------------------------------------------
def _linear_params(key, in_dim, out_dim):
    kw, kb = jax.random.split(key)
    bound = 1.0 / math.sqrt(in_dim)
    w = jax.random.uniform(kw, (in_dim, out_dim), jnp.float32, -bound, bound)
    b = jax.random.uniform(kb, (1, out_dim), jnp.float32, -bound, bound)
    return w, b


def make_adversarial_params(key, num_features, action_space):
    fa_dim = num_features + action_space
    ba_dim = 2 * num_features
    keys = jax.random.split(key, 6)
    return {
        "fwd_attn": _linear_params(keys[0], fa_dim, fa_dim),
        "fwd_l1":   _linear_params(keys[1], fa_dim, _HIDDEN),
        "fwd_l2":   _linear_params(keys[2], _HIDDEN, _FWD_OUT),
        "bwd_attn": _linear_params(keys[3], ba_dim, ba_dim),
        "bwd_l1":   _linear_params(keys[4], ba_dim, _HIDDEN),
        "bwd_l2":   _linear_params(keys[5], _HIDDEN, action_space),
    }


def prepare_kernel_params(params):
    """bf16 matmul weights; output-layer columns zero-padded to 128 multiples."""
    def pad_cols(a, to):
        if a.shape[-1] == to:
            return a
        return jnp.pad(a, ((0, 0), (0, to - a.shape[-1])))

    wfa, bfa = params["fwd_attn"]
    wf1, bf1 = params["fwd_l1"]
    wf2, bf2 = params["fwd_l2"]
    wba, bba = params["bwd_attn"]
    wb1, bb1 = params["bwd_l1"]
    wb2, bb2 = params["bwd_l2"]
    fwd_pad = _round_up(wf2.shape[1], 128)
    act_pad = _round_up(wb2.shape[1], 128)
    return {
        "wfa": wfa.astype(jnp.bfloat16), "bfa": bfa,
        "wf1": wf1.astype(jnp.bfloat16), "bf1": bf1,
        "wf2": pad_cols(wf2, fwd_pad).astype(jnp.bfloat16),
        "bf2": pad_cols(bf2, fwd_pad),
        "wba": wba.astype(jnp.bfloat16), "bba": bba,
        "wb1": wb1.astype(jnp.bfloat16), "bb1": bb1,
        "wb2": pad_cols(wb2, act_pad).astype(jnp.bfloat16),
        "bb2": pad_cols(bb2, act_pad),
    }


_WEIGHT_ORDER = ("wfa", "bfa", "wf1", "bf1", "wf2", "bf2",
                 "wba", "bba", "wb1", "bb1", "wb2", "bb2")


# ----------------------------------------------------------------------------
# Full forward pass (single pallas_call).
# ----------------------------------------------------------------------------
def adversarial_forward(kparams, current_feature, next_feature, current_action,
                        num_features, action_space):
    F = num_features
    A = action_space
    B = current_feature.shape[0]

    # Batch grid: weights stay VMEM-resident (index_map -> (0,0), same block index
    # every step -> no re-DMA); the batch axis is "parallel" so it shards across
    # TensorCores when production batches are large. BT capped at 512 so the
    # double-buffered activation tiles + f32 intermediates stay comfortably under
    # the default scoped-VMEM limit (and v7x's 64 MiB per-TC VMEM) at F=288.
    BT = min(512, _round_up(B, 8))
    B_pad = _round_up(B, BT)

    cf, nf = current_feature, next_feature
    act = current_action.astype(jnp.int32).reshape(B, 1)
    if B_pad != B:
        cf = jnp.pad(cf, ((0, B_pad - B), (0, 0)))
        nf = jnp.pad(nf, ((0, B_pad - B), (0, 0)))
        act = jnp.pad(act, ((0, B_pad - B), (0, 0)))

    weight_args = [kparams[k] for k in _WEIGHT_ORDER]
    fwd_pad = kparams["wf2"].shape[1]
    a_pad = kparams["wb2"].shape[1]
    fa_dim = F + A
    ba_dim = 2 * F

    def batch_spec(d):
        return pl.BlockSpec((BT, d), lambda i: (i, 0))

    def resident_spec(shape):
        return pl.BlockSpec(shape, lambda i: (0, 0))

    flops = 2 * B_pad * (fa_dim * fa_dim + fa_dim * _HIDDEN + _HIDDEN * fwd_pad
                         + ba_dim * ba_dim + ba_dim * _HIDDEN + _HIDDEN * a_pad)
    transcendentals = B_pad * (fa_dim + ba_dim + 2)
    bytes_accessed = sum(int(x.size) * x.dtype.itemsize
                         for x in [cf, nf, act] + weight_args)
    bytes_accessed += B_pad * (fwd_pad + a_pad) * 4

    kernel = functools.partial(_icm_kernel, num_features=F, action_space=A)

    out_f, out_b = pl.pallas_call(
        kernel,
        grid=(B_pad // BT,),
        in_specs=[batch_spec(F), batch_spec(F), batch_spec(1)]
                 + [resident_spec(w.shape) for w in weight_args],
        out_specs=(batch_spec(fwd_pad), batch_spec(a_pad)),
        out_shape=(jax.ShapeDtypeStruct((B_pad, fwd_pad), jnp.float32),
                   jax.ShapeDtypeStruct((B_pad, a_pad), jnp.float32)),
        compiler_params=pltpu.CompilerParams(
            dimension_semantics=("parallel",)),
        cost_estimate=pl.CostEstimate(flops=flops,
                                      transcendentals=transcendentals,
                                      bytes_accessed=bytes_accessed),
    )(cf, nf, act, *weight_args)

    return out_f[:B, :_FWD_OUT], out_b[:B, :A]


# Pure-JAX f32 reference (original module semantics) for correctness checks.
def _reference(params, current_feature, next_feature, current_action,
               action_space):
    def branch(x, attn, l1, l2):
        g = x * jax.nn.softmax(x @ attn[0] + attn[1], axis=-1)
        return (g @ l1[0] + l1[1]) @ l2[0] + l2[1]

    one_hot = jax.nn.one_hot(current_action.astype(jnp.int32), action_space,
                             dtype=jnp.float32)
    fa_in = jnp.concatenate([current_feature, one_hot], axis=1)
    ba_in = jnp.concatenate([current_feature, next_feature], axis=1)
    return (branch(fa_in, params["fwd_attn"], params["fwd_l1"], params["fwd_l2"]),
            branch(ba_in, params["bwd_attn"], params["bwd_l1"], params["bwd_l2"]))


if __name__ == "__main__":
    B = 2
    NUM_FEATURES = 32
    ACTION_SPACE = 8

    key = jax.random.PRNGKey(0)
    k_params, k_cur, k_next, k_act = jax.random.split(key, 4)

    params = make_adversarial_params(k_params, NUM_FEATURES, ACTION_SPACE)
    kparams = prepare_kernel_params(params)

    current_feature = jax.random.normal(k_cur, (B, NUM_FEATURES), jnp.float32)
    next_feature = jax.random.normal(k_next, (B, NUM_FEATURES), jnp.float32)
    current_action = jax.random.randint(k_act, (B,), 0, ACTION_SPACE)

    fwd = jax.jit(functools.partial(adversarial_forward,
                                    num_features=NUM_FEATURES,
                                    action_space=ACTION_SPACE))
    nfp, ap = fwd(kparams, current_feature, next_feature, current_action)
    nfp = jax.block_until_ready(nfp)
    ap = jax.block_until_ready(ap)

    nfp_ref, ap_ref = _reference(params, current_feature, next_feature,
                                 current_action, ACTION_SPACE)

    assert nfp.shape == (B, _FWD_OUT) and nfp.dtype == jnp.float32
    assert ap.shape == (B, ACTION_SPACE) and ap.dtype == jnp.float32
    # bf16 MXU operands + EUP approx reciprocal -> loose-but-safe tolerance vs f32 ref
    assert jnp.allclose(nfp, nfp_ref, atol=2e-2, rtol=2e-2), \
        float(jnp.max(jnp.abs(nfp - nfp_ref)))
    assert jnp.allclose(ap, ap_ref, atol=2e-2, rtol=2e-2), \
        float(jnp.max(jnp.abs(ap - ap_ref)))

    print("KERNEL_OK")
</pallas_src>

<mosaic_0001>
module attributes {stable_mosaic.version = 11 : i64} {
  func.func @_icm_kernel(%arg0: i32, %arg1: memref<8x32xf32, #tpu.memory_space<vmem>>, %arg2: memref<8x32xf32, #tpu.memory_space<vmem>>, %arg3: memref<8x1xi32, #tpu.memory_space<vmem>>, %arg4: memref<40x40xbf16, #tpu.memory_space<vmem>>, %arg5: memref<1x40xf32, #tpu.memory_space<vmem>>, %arg6: memref<40x256xbf16, #tpu.memory_space<vmem>>, %arg7: memref<1x256xf32, #tpu.memory_space<vmem>>, %arg8: memref<256x384xbf16, #tpu.memory_space<vmem>>, %arg9: memref<1x384xf32, #tpu.memory_space<vmem>>, %arg10: memref<64x64xbf16, #tpu.memory_space<vmem>>, %arg11: memref<1x64xf32, #tpu.memory_space<vmem>>, %arg12: memref<64x256xbf16, #tpu.memory_space<vmem>>, %arg13: memref<1x256xf32, #tpu.memory_space<vmem>>, %arg14: memref<256x128xbf16, #tpu.memory_space<vmem>>, %arg15: memref<1x128xf32, #tpu.memory_space<vmem>>, %arg16: memref<8x384xf32, #tpu.memory_space<vmem>>, %arg17: memref<8x128xf32, #tpu.memory_space<vmem>>) attributes {dimension_semantics = [#tpu.dimension_semantics<parallel>], iteration_bounds = array<i64: 1>, scalar_prefetch = 0 : i64, scratch_operands = 0 : i64, tpu.core_type = #tpu.core_type<tc>, window_params = [{transform_indices = @transform_0, window_bounds = array<i64: 8, 32>}, {transform_indices = @transform_1, window_bounds = array<i64: 8, 32>}, {transform_indices = @transform_2, window_bounds = array<i64: 8, 1>}, {pipeline_mode = #tpu.pipeline_mode<synchronous>, transform_indices = @transform_3, window_bounds = array<i64: 40, 40>}, {pipeline_mode = #tpu.pipeline_mode<synchronous>, transform_indices = @transform_4, window_bounds = array<i64: 1, 40>}, {pipeline_mode = #tpu.pipeline_mode<synchronous>, transform_indices = @transform_5, window_bounds = array<i64: 40, 256>}, {pipeline_mode = #tpu.pipeline_mode<synchronous>, transform_indices = @transform_6, window_bounds = array<i64: 1, 256>}, {pipeline_mode = #tpu.pipeline_mode<synchronous>, transform_indices = @transform_7, window_bounds = array<i64: 256, 384>}, {pipeline_mode = #tpu.pipeline_mode<synchronous>, transform_indices = @transform_8, window_bounds = array<i64: 1, 384>}, {pipeline_mode = #tpu.pipeline_mode<synchronous>, transform_indices = @transform_9, window_bounds = array<i64: 64, 64>}, {pipeline_mode = #tpu.pipeline_mode<synchronous>, transform_indices = @transform_10, window_bounds = array<i64: 1, 64>}, {pipeline_mode = #tpu.pipeline_mode<synchronous>, transform_indices = @transform_11, window_bounds = array<i64: 64, 256>}, {pipeline_mode = #tpu.pipeline_mode<synchronous>, transform_indices = @transform_12, window_bounds = array<i64: 1, 256>}, {pipeline_mode = #tpu.pipeline_mode<synchronous>, transform_indices = @transform_13, window_bounds = array<i64: 256, 128>}, {pipeline_mode = #tpu.pipeline_mode<synchronous>, transform_indices = @transform_14, window_bounds = array<i64: 1, 128>}, {transform_indices = @transform_15, window_bounds = array<i64: 8, 384>}, {transform_indices = @transform_16, window_bounds = array<i64: 8, 128>}]} {
    %c0 = arith.constant 0 : index
    %c0_0 = arith.constant 0 : index
    %0 = vector.load %arg1[%c0, %c0_0] : memref<8x32xf32, #tpu.memory_space<vmem>>, vector<8x32xf32>
    %c0_1 = arith.constant 0 : index
    %c0_2 = arith.constant 0 : index
    %1 = vector.load %arg2[%c0_1, %c0_2] : memref<8x32xf32, #tpu.memory_space<vmem>>, vector<8x32xf32>
    %c0_3 = arith.constant 0 : index
    %c0_4 = arith.constant 0 : index
    %2 = vector.load %arg3[%c0_3, %c0_4] : memref<8x1xi32, #tpu.memory_space<vmem>>, vector<8x1xi32>
    %3 = tpu.iota {dimensions = array<i32: 1>} : vector<8x8xi32>
    %4 = vector.broadcast %2 : vector<8x1xi32> to vector<8x8xi32>
    %5 = arith.cmpi eq, %3, %4 : vector<8x8xi32>
    %6 = arith.extui %5 : vector<8x8xi1> to vector<8x8xi32>
    %7 = arith.sitofp %6 : vector<8x8xi32> to vector<8x8xf32>
    %8 = arith.truncf %0 : vector<8x32xf32> to vector<8x32xbf16>
    %9 = arith.truncf %1 : vector<8x32xf32> to vector<8x32xbf16>
    %10 = arith.truncf %7 : vector<8x8xf32> to vector<8x8xbf16>
    %c0_5 = arith.constant 0 : index
    %c0_6 = arith.constant 0 : index
    %11 = vector.load %arg4[%c0_5, %c0_6] : memref<40x40xbf16, #tpu.memory_space<vmem>>, vector<32x40xbf16>
    %cst = arith.constant dense<0.000000e+00> : vector<8x40xf32>
    %12 = tpu.matmul %8, %11, %cst {dimension_numbers = #tpu.dot_dimension_numbers<[1], [0], [0], [1], [0, 0, 1, 1], [], []>} : vector<8x32xbf16>, vector<32x40xbf16>, vector<8x40xf32> -> vector<8x40xf32>
    %c32 = arith.constant 32 : index
    %c0_7 = arith.constant 0 : index
    %13 = vector.load %arg4[%c32, %c0_7] : memref<40x40xbf16, #tpu.memory_space<vmem>>, vector<8x40xbf16>
    %cst_8 = arith.constant dense<0.000000e+00> : vector<8x40xf32>
    %14 = tpu.matmul %10, %13, %cst_8 {dimension_numbers = #tpu.dot_dimension_numbers<[1], [0], [0], [1], [0, 0, 1, 1], [], []>} : vector<8x8xbf16>, vector<8x40xbf16>, vector<8x40xf32> -> vector<8x40xf32>
    %15 = arith.addf %12, %14 : vector<8x40xf32>
    %c0_9 = arith.constant 0 : index
    %c0_10 = arith.constant 0 : index
    %16 = vector.load %arg5[%c0_9, %c0_10] : memref<1x40xf32, #tpu.memory_space<vmem>>, vector<1x40xf32>
    %17 = vector.broadcast %16 : vector<1x40xf32> to vector<8x40xf32>
    %18 = arith.addf %15, %17 : vector<8x40xf32>
    %cst_11 = arith.constant dense<0xFF800000> : vector<8xf32>
    %19 = vector.multi_reduction <maximumf>, %18, %cst_11 [1] : vector<8x40xf32> to vector<8xf32>
    %20 = vector.shape_cast %19 : vector<8xf32> to vector<8x1xf32>
    %21 = vector.broadcast %20 : vector<8x1xf32> to vector<8x40xf32>
    %22 = arith.subf %18, %21 : vector<8x40xf32>
    %23 = math.exp %22 : vector<8x40xf32>
    %cst_12 = arith.constant dense<0.000000e+00> : vector<8xf32>
    %24 = vector.multi_reduction <add>, %23, %cst_12 [1] : vector<8x40xf32> to vector<8xf32>
    %25 = vector.shape_cast %24 : vector<8xf32> to vector<8x1xf32>
    %26 = tpu.reciprocal %25 {approx = true} : vector<8x1xf32> -> vector<8x1xf32>
    %27 = vector.broadcast %26 : vector<8x1xf32> to vector<8x40xf32>
    %28 = arith.mulf %23, %27 : vector<8x40xf32>
    %29 = vector.extract_strided_slice %28 {offsets = [0, 0], sizes = [8, 32], strides = [1, 1]} : vector<8x40xf32> to vector<8x32xf32>
    %30 = arith.mulf %0, %29 : vector<8x32xf32>
    %31 = arith.truncf %30 : vector<8x32xf32> to vector<8x32xbf16>
    %32 = vector.extract_strided_slice %28 {offsets = [0, 32], sizes = [8, 8], strides = [1, 1]} : vector<8x40xf32> to vector<8x8xf32>
    %33 = arith.mulf %7, %32 : vector<8x8xf32>
    %34 = arith.truncf %33 : vector<8x8xf32> to vector<8x8xbf16>
    %c0_13 = arith.constant 0 : index
    %c0_14 = arith.constant 0 : index
    %35 = vector.load %arg6[%c0_13, %c0_14] : memref<40x256xbf16, #tpu.memory_space<vmem>>, vector<32x256xbf16>
    %cst_15 = arith.constant dense<0.000000e+00> : vector<8x256xf32>
    %36 = tpu.matmul %31, %35, %cst_15 {dimension_numbers = #tpu.dot_dimension_numbers<[1], [0], [0], [1], [0, 0, 1, 1], [], []>} : vector<8x32xbf16>, vector<32x256xbf16>, vector<8x256xf32> -> vector<8x256xf32>
    %c32_16 = arith.constant 32 : index
    %c0_17 = arith.constant 0 : index
    %37 = vector.load %arg6[%c32_16, %c0_17] : memref<40x256xbf16, #tpu.memory_space<vmem>>, vector<8x256xbf16>
    %cst_18 = arith.constant dense<0.000000e+00> : vector<8x256xf32>
    %38 = tpu.matmul %34, %37, %cst_18 {dimension_numbers = #tpu.dot_dimension_numbers<[1], [0], [0], [1], [0, 0, 1, 1], [], []>} : vector<8x8xbf16>, vector<8x256xbf16>, vector<8x256xf32> -> vector<8x256xf32>
    %39 = arith.addf %36, %38 : vector<8x256xf32>
    %c0_19 = arith.constant 0 : index
    %c0_20 = arith.constant 0 : index
    %40 = vector.load %arg7[%c0_19, %c0_20] : memref<1x256xf32, #tpu.memory_space<vmem>>, vector<1x256xf32>
    %41 = vector.broadcast %40 : vector<1x256xf32> to vector<8x256xf32>
    %42 = arith.addf %39, %41 : vector<8x256xf32>
    %43 = arith.truncf %42 : vector<8x256xf32> to vector<8x256xbf16>
    %c0_21 = arith.constant 0 : index
    %c0_22 = arith.constant 0 : index
    %44 = vector.load %arg8[%c0_21, %c0_22] : memref<256x384xbf16, #tpu.memory_space<vmem>>, vector<256x384xbf16>
    %cst_23 = arith.constant dense<0.000000e+00> : vector<8x384xf32>
    %45 = tpu.matmul %43, %44, %cst_23 {dimension_numbers = #tpu.dot_dimension_numbers<[1], [0], [0], [1], [0, 0, 1, 1], [], []>} : vector<8x256xbf16>, vector<256x384xbf16>, vector<8x384xf32> -> vector<8x384xf32>
    %c0_24 = arith.constant 0 : index
    %c0_25 = arith.constant 0 : index
    %46 = vector.load %arg9[%c0_24, %c0_25] : memref<1x384xf32, #tpu.memory_space<vmem>>, vector<1x384xf32>
    %47 = vector.broadcast %46 : vector<1x384xf32> to vector<8x384xf32>
    %48 = arith.addf %45, %47 : vector<8x384xf32>
    %c0_26 = arith.constant 0 : index
    %c0_27 = arith.constant 0 : index
    %49 = vector.load %arg16[%c0_26, %c0_27] : memref<8x384xf32, #tpu.memory_space<vmem>>, vector<8x384xf32>
    tpu.vector_store %arg16[%c0_26, %c0_27], %48 {strides = array<i32>} : memref<8x384xf32, #tpu.memory_space<vmem>>, vector<8x384xf32>,
    %c0_28 = arith.constant 0 : index
    %c0_29 = arith.constant 0 : index
    %50 = vector.load %arg10[%c0_28, %c0_29] : memref<64x64xbf16, #tpu.memory_space<vmem>>, vector<32x64xbf16>
    %cst_30 = arith.constant dense<0.000000e+00> : vector<8x64xf32>
    %51 = tpu.matmul %8, %50, %cst_30 {dimension_numbers = #tpu.dot_dimension_numbers<[1], [0], [0], [1], [0, 0, 1, 1], [], []>} : vector<8x32xbf16>, vector<32x64xbf16>, vector<8x64xf32> -> vector<8x64xf32>
    %c32_31 = arith.constant 32 : index
    %c0_32 = arith.constant 0 : index
    %52 = vector.load %arg10[%c32_31, %c0_32] : memref<64x64xbf16, #tpu.memory_space<vmem>>, vector<32x64xbf16>
    %cst_33 = arith.constant dense<0.000000e+00> : vector<8x64xf32>
    %53 = tpu.matmul %9, %52, %cst_33 {dimension_numbers = #tpu.dot_dimension_numbers<[1], [0], [0], [1], [0, 0, 1, 1], [], []>} : vector<8x32xbf16>, vector<32x64xbf16>, vector<8x64xf32> -> vector<8x64xf32>
    %54 = arith.addf %51, %53 : vector<8x64xf32>
    %c0_34 = arith.constant 0 : index
    %c0_35 = arith.constant 0 : index
    %55 = vector.load %arg11[%c0_34, %c0_35] : memref<1x64xf32, #tpu.memory_space<vmem>>, vector<1x64xf32>
    %56 = vector.broadcast %55 : vector<1x64xf32> to vector<8x64xf32>
    %57 = arith.addf %54, %56 : vector<8x64xf32>
    %cst_36 = arith.constant dense<0xFF800000> : vector<8xf32>
    %58 = vector.multi_reduction <maximumf>, %57, %cst_36 [1] : vector<8x64xf32> to vector<8xf32>
    %59 = vector.shape_cast %58 : vector<8xf32> to vector<8x1xf32>
    %60 = vector.broadcast %59 : vector<8x1xf32> to vector<8x64xf32>
    %61 = arith.subf %57, %60 : vector<8x64xf32>
    %62 = math.exp %61 : vector<8x64xf32>
    %cst_37 = arith.constant dense<0.000000e+00> : vector<8xf32>
    %63 = vector.multi_reduction <add>, %62, %cst_37 [1] : vector<8x64xf32> to vector<8xf32>
    %64 = vector.shape_cast %63 : vector<8xf32> to vector<8x1xf32>
    %65 = tpu.reciprocal %64 {approx = true} : vector<8x1xf32> -> vector<8x1xf32>
    %66 = vector.broadcast %65 : vector<8x1xf32> to vector<8x64xf32>
    %67 = arith.mulf %62, %66 : vector<8x64xf32>
    %68 = vector.extract_strided_slice %67 {offsets = [0, 0], sizes = [8, 32], strides = [1, 1]} : vector<8x64xf32> to vector<8x32xf32>
    %69 = arith.mulf %0, %68 : vector<8x32xf32>
    %70 = arith.truncf %69 : vector<8x32xf32> to vector<8x32xbf16>
    %71 = vector.extract_strided_slice %67 {offsets = [0, 32], sizes = [8, 32], strides = [1, 1]} : vector<8x64xf32> to vector<8x32xf32>
    %72 = arith.mulf %1, %71 : vector<8x32xf32>
    %73 = arith.truncf %72 : vector<8x32xf32> to vector<8x32xbf16>
    %c0_38 = arith.constant 0 : index
    %c0_39 = arith.constant 0 : index
    %74 = vector.load %arg12[%c0_38, %c0_39] : memref<64x256xbf16, #tpu.memory_space<vmem>>, vector<32x256xbf16>
    %cst_40 = arith.constant dense<0.000000e+00> : vector<8x256xf32>
    %75 = tpu.matmul %70, %74, %cst_40 {dimension_numbers = #tpu.dot_dimension_numbers<[1], [0], [0], [1], [0, 0, 1, 1], [], []>} : vector<8x32xbf16>, vector<32x256xbf16>, vector<8x256xf32> -> vector<8x256xf32>
    %c32_41 = arith.constant 32 : index
    %c0_42 = arith.constant 0 : index
    %76 = vector.load %arg12[%c32_41, %c0_42] : memref<64x256xbf16, #tpu.memory_space<vmem>>, vector<32x256xbf16>
    %cst_43 = arith.constant dense<0.000000e+00> : vector<8x256xf32>
    %77 = tpu.matmul %73, %76, %cst_43 {dimension_numbers = #tpu.dot_dimension_numbers<[1], [0], [0], [1], [0, 0, 1, 1], [], []>} : vector<8x32xbf16>, vector<32x256xbf16>, vector<8x256xf32> -> vector<8x256xf32>
    %78 = arith.addf %75, %77 : vector<8x256xf32>
    %c0_44 = arith.constant 0 : index
    %c0_45 = arith.constant 0 : index
    %79 = vector.load %arg13[%c0_44, %c0_45] : memref<1x256xf32, #tpu.memory_space<vmem>>, vector<1x256xf32>
    %80 = vector.broadcast %79 : vector<1x256xf32> to vector<8x256xf32>
    %81 = arith.addf %78, %80 : vector<8x256xf32>
    %82 = arith.truncf %81 : vector<8x256xf32> to vector<8x256xbf16>
    %c0_46 = arith.constant 0 : index
    %c0_47 = arith.constant 0 : index
    %83 = vector.load %arg14[%c0_46, %c0_47] : memref<256x128xbf16, #tpu.memory_space<vmem>>, vector<256x128xbf16>
    %cst_48 = arith.constant dense<0.000000e+00> : vector<8x128xf32>
    %84 = tpu.matmul %82, %83, %cst_48 {dimension_numbers = #tpu.dot_dimension_numbers<[1], [0], [0], [1], [0, 0, 1, 1], [], []>} : vector<8x256xbf16>, vector<256x128xbf16>, vector<8x128xf32> -> vector<8x128xf32>
    %c0_49 = arith.constant 0 : index
    %c0_50 = arith.constant 0 : index
    %85 = vector.load %arg15[%c0_49, %c0_50] : memref<1x128xf32, #tpu.memory_space<vmem>>, vector<1x128xf32>
    %86 = vector.broadcast %85 : vector<1x128xf32> to vector<8x128xf32>
    %87 = arith.addf %84, %86 : vector<8x128xf32>
    %c0_51 = arith.constant 0 : index
    %c0_52 = arith.constant 0 : index
    %88 = vector.load %arg17[%c0_51, %c0_52] : memref<8x128xf32, #tpu.memory_space<vmem>>, vector<8x128xf32>
    tpu.vector_store %arg17[%c0_51, %c0_52], %87 {strides = array<i32>} : memref<8x128xf32, #tpu.memory_space<vmem>>, vector<8x128xf32>,
    return
  }
  func.func @transform_0(%arg0: i32) -> (i32, i32) {
    %c0_i32 = arith.constant 0 : i32
    %c0_i32_0 = arith.constant 0 : i32
    return %arg0, %c0_i32 : i32, i32
  }
  func.func @transform_1(%arg0: i32) -> (i32, i32) {
    %c0_i32 = arith.constant 0 : i32
    %c0_i32_0 = arith.constant 0 : i32
    return %arg0, %c0_i32 : i32, i32
  }
  func.func @transform_2(%arg0: i32) -> (i32, i32) {
    %c0_i32 = arith.constant 0 : i32
    %c0_i32_0 = arith.constant 0 : i32
    return %arg0, %c0_i32 : i32, i32
  }
  func.func @transform_3(%arg0: i32) -> (i32, i32) {
    %c0_i32 = arith.constant 0 : i32
    %c0_i32_0 = arith.constant 0 : i32
    %c0_i32_1 = arith.constant 0 : i32
    return %c0_i32, %c0_i32_0 : i32, i32
  }
  func.func @transform_4(%arg0: i32) -> (i32, i32) {
    %c0_i32 = arith.constant 0 : i32
    %c0_i32_0 = arith.constant 0 : i32
    %c0_i32_1 = arith.constant 0 : i32
    return %c0_i32, %c0_i32_0 : i32, i32
  }
  func.func @transform_5(%arg0: i32) -> (i32, i32) {
    %c0_i32 = arith.constant 0 : i32
    %c0_i32_0 = arith.constant 0 : i32
    %c0_i32_1 = arith.constant 0 : i32
    return %c0_i32, %c0_i32_0 : i32, i32
  }
  func.func @transform_6(%arg0: i32) -> (i32, i32) {
    %c0_i32 = arith.constant 0 : i32
    %c0_i32_0 = arith.constant 0 : i32
    %c0_i32_1 = arith.constant 0 : i32
    return %c0_i32, %c0_i32_0 : i32, i32
  }
  func.func @transform_7(%arg0: i32) -> (i32, i32) {
    %c0_i32 = arith.constant 0 : i32
    %c0_i32_0 = arith.constant 0 : i32
    %c0_i32_1 = arith.constant 0 : i32
    return %c0_i32, %c0_i32_0 : i32, i32
  }
  func.func @transform_8(%arg0: i32) -> (i32, i32) {
    %c0_i32 = arith.constant 0 : i32
    %c0_i32_0 = arith.constant 0 : i32
    %c0_i32_1 = arith.constant 0 : i32
    return %c0_i32, %c0_i32_0 : i32, i32
  }
  func.func @transform_9(%arg0: i32) -> (i32, i32) {
    %c0_i32 = arith.constant 0 : i32
    %c0_i32_0 = arith.constant 0 : i32
    %c0_i32_1 = arith.constant 0 : i32
    return %c0_i32, %c0_i32_0 : i32, i32
  }
  func.func @transform_10(%arg0: i32) -> (i32, i32) {
    %c0_i32 = arith.constant 0 : i32
    %c0_i32_0 = arith.constant 0 : i32
    %c0_i32_1 = arith.constant 0 : i32
    return %c0_i32, %c0_i32_0 : i32, i32
  }
  func.func @transform_11(%arg0: i32) -> (i32, i32) {
    %c0_i32 = arith.constant 0 : i32
    %c0_i32_0 = arith.constant 0 : i32
    %c0_i32_1 = arith.constant 0 : i32
    return %c0_i32, %c0_i32_0 : i32, i32
  }
  func.func @transform_12(%arg0: i32) -> (i32, i32) {
    %c0_i32 = arith.constant 0 : i32
    %c0_i32_0 = arith.constant 0 : i32
    %c0_i32_1 = arith.constant 0 : i32
    return %c0_i32, %c0_i32_0 : i32, i32
  }
  func.func @transform_13(%arg0: i32) -> (i32, i32) {
    %c0_i32 = arith.constant 0 : i32
    %c0_i32_0 = arith.constant 0 : i32
    %c0_i32_1 = arith.constant 0 : i32
    return %c0_i32, %c0_i32_0 : i32, i32
  }
  func.func @transform_14(%arg0: i32) -> (i32, i32) {
    %c0_i32 = arith.constant 0 : i32
    %c0_i32_0 = arith.constant 0 : i32
    %c0_i32_1 = arith.constant 0 : i32
    return %c0_i32, %c0_i32_0 : i32, i32
  }
  func.func @transform_15(%arg0: i32) -> (i32, i32) {
    %c0_i32 = arith.constant 0 : i32
    %c0_i32_0 = arith.constant 0 : i32
    return %arg0, %c0_i32 : i32, i32
  }
  func.func @transform_16(%arg0: i32) -> (i32, i32) {
    %c0_i32 = arith.constant 0 : i32
    %c0_i32_0 = arith.constant 0 : i32
    return %arg0, %c0_i32 : i32, i32
  }
}

</mosaic_0001>

<bundles_post_ra>
// kernel: adversarial_forward.1
= control target key start
LH: loop header
LB: loop body
LE: loop exit
PB: predicated region body
PF: predicated region fallthrough
CT: control target
= control target key end

     0   :  { %s2214_s0 = inlined_call_operand.vmem [shape: f32[8,32], index: 0, kind: input, shape index: {}]   ;;  %s2215_s1 = inlined_call_operand.vmem [shape: f32[8,32], index: 1, kind: input, shape index: {}]   ;;  %s2216_s2 = inlined_call_operand.vmem [shape: s32[8,1], index: 2, kind: input, shape index: {}]   ;;  %s2217_s3 = inlined_call_operand.hbm [shape: bf16[40,40], index: 3, kind: input, shape index: {}]   ;;  %s2218_s4 = inlined_call_operand.hbm [shape: f32[1,40], index: 4, kind: input, shape index: {}]   ;;  %s2219_s5 = inlined_call_operand.vmem [shape: bf16[40,256], index: 5, kind: input, shape index: {}]   ;;  %s2220_s6 = inlined_call_operand.vmem [shape: f32[1,256], index: 6, kind: input, shape index: {}]   ;;  %s2221_s7 = inlined_call_operand.hbm [shape: bf16[256,384], index: 7, kind: input, shape index: {}]   ;;  %s2222_s8 = inlined_call_operand.hbm [shape: f32[1,384], index: 8, kind: input, shape index: {}]   ;;  %s2223_s9 = inlined_call_operand.vmem [shape: bf16[64,64], index: 9, kind: input, shape index: {}]   ;;  %s2224_s10 = inlined_call_operand.hbm [shape: f32[1,64], index: 10, kind: input, shape index: {}]   ;;  %s2225_s11 = inlined_call_operand.hbm [shape: bf16[64,256], index: 11, kind: input, shape index: {}]   ;;  %s2226_s12 = inlined_call_operand.hbm [shape: f32[1,256], index: 12, kind: input, shape index: {}]   ;;  %s2227_s13 = inlined_call_operand.hbm [shape: bf16[256,128], index: 13, kind: input, shape index: {}]   ;;  %s2228_s14 = inlined_call_operand.hbm [shape: f32[1,128], index: 14, kind: input, shape index: {}]   ;;  %s2229_s15 = inlined_call_operand.vmem [shape: f32[8,384], index: 15, kind: output, shape index: {0}]   ;;  %s2230_s16 = inlined_call_operand.vmem [shape: f32[8,128], index: 16, kind: output, shape index: {1}]  }
   0x1   :  { %2231 = sst [smem:[#allocation21_spill]] %s2214_s0 }
   0x2   :  { %22 = vsyncpa [#allocation3], 0 }
   0x3   :  { %23 = vsyncpa [#allocation5], 0 }
   0x4   :  { %24 = vsyncpa [#allocation8], 0 }
   0x5   :  { %25 = vsyncpa [#allocation11], 0 }
   0x6   :  { %26 = vsyncpa [#allocation14], 0  ;;  %s1885_s21 = smov [#allocation4]   ;;  %s1886_s23 = smov [#allocation7]  }
   0x7   :  { %s51_s22 = sshll.u32 %s1885_s21, 4  ;;  %s77_s24 = sshll.u32 %s1886_s23, 4  ;;  %s52_s22 = int_to_ptr.vmem [resolvable:$true] %s51_s22  ;;  %s78_s24 = int_to_ptr.vmem [resolvable:$true] %s77_s24 }
   0x8   :  { %s1677_s27 = scalar_lea.hbm %s2218_s4, 16 }
   0x9   :  { %p1678_p0 = scmp.ne.s32.totalorder %s2218_s4, %s1677_s27  ;;  %p1681_p1 = scmp.lt.u32.totalorder %s1677_s27, %s2218_s4 }
   0xb   :  { %p1683_p2 = pnand %p1681_p1, %p1678_p0 }
   0xd   :  { %1686 = shalt.err (!%p1683_p2)
}
   0xe   :  { %s1687_s17 = scalar_lea.vmem %s52_s22, 16  ;;  %s1691_s18 = scalar_lea.vmem %s52_s22, 32 }
   0xf   :  { %p1688_p3 = scmp.ne.s32.totalorder %s52_s22, %s1687_s17  ;;  %p1692_p4 = scmp.lt.s32.totalorder %s52_s22, %s52_s22 }
  0x10   :  { %p1693_p5 = scmp.lt.s32.totalorder %s1691_s18, %s1687_s17 }
  0x12   :  { %p1694_p6 = por %p1693_p5, %p1692_p4 }
  0x14   :  { %p1695_p7 = pnand %p1694_p6, %p1688_p3 }
  0x16   :  { %1698 = shalt.err (!%p1695_p7)
}
  0x17   :  { %54 = dma.hbm_to_vmem [thread:$0]  %s2218_s4, 16, %s52_s22, [#allocation5]  }
  0x18   :  { %s1699_s25 = scalar_lea.hbm %s2222_s8, 48 }
  0x19   :  { %p1700_p8 = scmp.ne.s32.totalorder %s2222_s8, %s1699_s25  ;;  %p1703_p9 = scmp.lt.u32.totalorder %s1699_s25, %s2222_s8 }
  0x1b   :  { %p1705_p10 = pnand %p1703_p9, %p1700_p8 }
  0x1d   :  { %1708 = shalt.err (!%p1705_p10)
}
  0x1e   :  { %s1709_s30 = scalar_lea.vmem %s78_s24, 48  ;;  %s1713_s0 = scalar_lea.vmem %s78_s24, 64 }
  0x1f   :  { %p1710_p11 = scmp.ne.s32.totalorder %s78_s24, %s1709_s30  ;;  %p1714_p12 = scmp.lt.s32.totalorder %s78_s24, %s78_s24 }
  0x20   :  { %p1715_p13 = scmp.lt.s32.totalorder %s1713_s0, %s1709_s30 }
  0x22   :  { %p1716_p0 = por %p1715_p13, %p1714_p12 }
  0x24   :  { %p1717_p1 = pnand %p1716_p0, %p1710_p11 }
  0x26   :  { %1720 = shalt.err (!%p1717_p1)
}
  0x27   :  { %80 = dma.hbm_to_vmem [thread:$0]  %s2222_s8, 48, %s78_s24, [#allocation8]  }
  0x28   :  { %s1887_s17 = smov [#allocation10]   ;;  %s1721_s21 = scalar_lea.hbm %s2225_s11, 1024 }
  0x29   :  { %s98_s18 = sshll.u32 %s1887_s17, 4  ;;  %p1722_p2 = scmp.ne.s32.totalorder %s2225_s11, %s1721_s21  ;;  %s99_s18 = int_to_ptr.vmem [resolvable:$true] %s98_s18 }
  0x2a   :  { %p1725_p3 = scmp.lt.u32.totalorder %s1721_s21, %s2225_s11 }
  0x2c   :  { %p1727_p4 = pnand %p1725_p3, %p1722_p2 }
  0x2e   :  { %1730 = shalt.err (!%p1727_p4)
}
  0x2f   :  { %s1731_s28 = scalar_lea.vmem %s99_s18, 1024  ;;  %p1736_p6 = scmp.lt.s32.totalorder %s99_s18, %s99_s18 }
  0x30   :  { %p1732_p5 = scmp.ne.s32.totalorder %s99_s18, %s1731_s28  ;;  %p1737_p7 = scmp.lt.s32.totalorder %s1731_s28, %s1731_s28 }
  0x32   :  { %p1738_p8 = por %p1737_p7, %p1736_p6 }
  0x34   :  { %p1739_p9 = pnand %p1738_p8, %p1732_p5 }
  0x36   :  { %1742 = shalt.err (!%p1739_p9)
}
  0x37   :  { %s1888_s8 = smov 128   ;;  %s1889_s24 = smov 8  }
  0x38   :  { %104 = dma.hbm_to_vmem [thread:$0]  %s2225_s11, 1024, %s99_s18, [#allocation11], %s1888_s8, %s1888_s8, %s1889_s24  }
  0x39   :  { %s1890_s0 = smov [#allocation13]   ;;  %s1891_s22 = smov [#allocation2]  }
  0x3a   :  { %s120_s4 = sshll.u32 %s1890_s0, 4  ;;  %s38_s17 = sshll.u32 %s1891_s22, 4  ;;  %s121_s4 = int_to_ptr.vmem [resolvable:$true] %s120_s4  ;;  %s39_s17 = int_to_ptr.vmem [resolvable:$true] %s38_s17 }
  0x3b   :  { %s1743_s21 = scalar_lea.hbm %s2227_s13, 2048 }
  0x3c   :  { %p1744_p10 = scmp.ne.s32.totalorder %s2227_s13, %s1743_s21  ;;  %p1747_p11 = scmp.lt.u32.totalorder %s1743_s21, %s2227_s13 }
  0x3e   :  { %p1749_p12 = pnand %p1747_p11, %p1744_p10 }
  0x40   :  { %1752 = shalt.err (!%p1749_p12)
}
  0x41   :  { %s1753_s11 = scalar_lea.vmem %s121_s4, 2048  ;;  %p1758_p0 = scmp.lt.s32.totalorder %s121_s4, %s121_s4 }
  0x42   :  { %p1754_p13 = scmp.ne.s32.totalorder %s121_s4, %s1753_s11  ;;  %p1759_p1 = scmp.lt.s32.totalorder %s1753_s11, %s1753_s11 }
  0x44   :  { %p1760_p2 = por %p1759_p1, %p1758_p0 }
  0x46   :  { %p1761_p3 = pnand %p1760_p2, %p1754_p13 }
  0x48   :  { %1764 = shalt.err (!%p1761_p3)
}
  0x49   :  { %s1892_s18 = smov 64   ;;  %s1893_s28 = smov 4  }
  0x4a   :  { %126 = dma.hbm_to_vmem [thread:$0]  %s2227_s13, 2048, %s121_s4, [#allocation14], %s1892_s18, %s1892_s18, %s1893_s28  }
  0x4b   :  { %s1765_s0 = scalar_lea.hbm %s2217_s3, 320 }
  0x4c   :  { %p1766_p4 = scmp.ne.s32.totalorder %s2217_s3, %s1765_s0  ;;  %p1769_p5 = scmp.lt.u32.totalorder %s1765_s0, %s2217_s3 }
  0x4e   :  { %p1771_p6 = pnand %p1769_p5, %p1766_p4 }
  0x50   :  { %1774 = shalt.err (!%p1771_p6)
}
  0x51   :  { %s1775_s23 = scalar_lea.vmem %s39_s17, 320  ;;  %p1780_p8 = scmp.lt.s32.totalorder %s39_s17, %s39_s17 }
  0x52   :  { %p1776_p7 = scmp.ne.s32.totalorder %s39_s17, %s1775_s23  ;;  %p1781_p9 = scmp.lt.s32.totalorder %s1775_s23, %s1775_s23 }
  0x54   :  { %p1782_p10 = por %p1781_p9, %p1780_p8 }
  0x56   :  { %p1783_p11 = pnand %p1782_p10, %p1776_p7 }
  0x58   :  { %1786 = shalt.err (!%p1783_p11)
}
  0x59   :  { %44 = dma.hbm_to_vmem [thread:$0]  %s2217_s3, 320, %s39_s17, [#allocation3], %s1892_s18, %s1892_s18, %s1893_s28  }
  0x5a   :  { %s1894_s25 = smov [#allocation6]   ;;  %s1787_s8 = scalar_lea.hbm %s2221_s7, 6144 }
  0x5b   :  { %s64_s26 = sshll.u32 %s1894_s25, 4  ;;  %p1788_p12 = scmp.ne.s32.totalorder %s2221_s7, %s1787_s8  ;;  %s65_s26 = int_to_ptr.vmem [resolvable:$true] %s64_s26 }
  0x5c   :  { %p1791_p13 = scmp.lt.u32.totalorder %s1787_s8, %s2221_s7 }
  0x5e   :  { %p1793_p0 = pnand %p1791_p13, %p1788_p12 }
  0x60   :  { %1796 = shalt.err (!%p1793_p0)
}
  0x61   :  { %s1797_s22 = scalar_lea.vmem %s65_s26, 6144  ;;  %p1802_p2 = scmp.lt.s32.totalorder %s65_s26, %s65_s26 }
  0x62   :  { %p1798_p1 = scmp.ne.s32.totalorder %s65_s26, %s1797_s22  ;;  %p1803_p3 = scmp.lt.s32.totalorder %s1797_s22, %s1797_s22 }
  0x64   :  { %p1804_p4 = por %p1803_p3, %p1802_p2 }
  0x66   :  { %p1805_p5 = pnand %p1804_p4, %p1798_p1 }
  0x68   :  { %1808 = shalt.err (!%p1805_p5)
}
  0x69   :  { %s1895_s3 = smov 192   ;;  %s1896_s17 = smov 12  }
  0x6a   :  { %70 = dma.hbm_to_vmem [thread:$0]  %s2221_s7, 6144, %s65_s26, [#allocation5], %s1895_s3, %s1895_s3, %s1896_s17  }
  0x6b   :  { %s1897_s19 = smov [#allocation9]   ;;  %s1898_s21 = smov [#allocation12]  }
  0x6c   :  { %s89_s20 = sshll.u32 %s1897_s19, 4  ;;  %s111_s23 = sshll.u32 %s1898_s21, 4  ;;  %s90_s20 = int_to_ptr.vmem [resolvable:$true] %s89_s20  ;;  %s112_s23 = int_to_ptr.vmem [resolvable:$true] %s111_s23 }
  0x6d   :  { %s1809_s25 = scalar_lea.hbm %s2224_s10, 16 }
  0x6e   :  { %p1810_p6 = scmp.ne.s32.totalorder %s2224_s10, %s1809_s25  ;;  %p1813_p7 = scmp.lt.u32.totalorder %s1809_s25, %s2224_s10 }
  0x70   :  { %p1815_p8 = pnand %p1813_p7, %p1810_p6 }
  0x72   :  { %1818 = shalt.err (!%p1815_p8)
}
  0x73   :  { %s1819_s7 = scalar_lea.vmem %s90_s20, 16  ;;  %s1823_s26 = scalar_lea.vmem %s90_s20, 32 }
  0x74   :  { %p1820_p9 = scmp.ne.s32.totalorder %s90_s20, %s1819_s7  ;;  %p1824_p10 = scmp.lt.s32.totalorder %s90_s20, %s90_s20 }
  0x75   :  { %p1825_p11 = scmp.lt.s32.totalorder %s1823_s26, %s1819_s7 }
  0x77   :  { %p1826_p12 = por %p1825_p11, %p1824_p10 }
  0x79   :  { %p1827_p13 = pnand %p1826_p12, %p1820_p9 }
  0x7b   :  { %1830 = shalt.err (!%p1827_p13)
}
  0x7c   :  { %92 = dma.hbm_to_vmem [thread:$0]  %s2224_s10, 16, %s90_s20, [#allocation8]  }
  0x7d   :  { %s1831_s3 = scalar_lea.hbm %s2226_s12, 32 }
  0x7e   :  { %p1832_p0 = scmp.ne.s32.totalorder %s2226_s12, %s1831_s3  ;;  %p1835_p1 = scmp.lt.u32.totalorder %s1831_s3, %s2226_s12 }
  0x80   :  { %p1837_p2 = pnand %p1835_p1, %p1832_p0 }
  0x82   :  { %1840 = shalt.err (!%p1837_p2)
}
  0x83   :  { %s1841_s21 = scalar_lea.vmem %s112_s23, 32  ;;  %p1846_p4 = scmp.lt.s32.totalorder %s112_s23, %s112_s23 }
  0x84   :  { %p1842_p3 = scmp.ne.s32.totalorder %s112_s23, %s1841_s21  ;;  %p1847_p5 = scmp.lt.s32.totalorder %s1841_s21, %s1841_s21 }
  0x86   :  { %p1848_p6 = por %p1847_p5, %p1846_p4 }
  0x88   :  { %p1849_p7 = pnand %p1848_p6, %p1842_p3 }
  0x8a   :  { %1852 = shalt.err (!%p1849_p7)
}
  0x8b   :  { %114 = dma.hbm_to_vmem [thread:$0]  %s2226_s12, 32, %s112_s23, [#allocation11]  }
  0x8c   :  { %s1899_s13 = smov [#allocation15]   ;;  %s1853_s11 = scalar_lea.hbm %s2228_s14, 16 }
  0x8d   :  { %s133_s4 = sshll.u32 %s1899_s13, 4  ;;  %p1854_p8 = scmp.ne.s32.totalorder %s2228_s14, %s1853_s11  ;;  %s134_s4 = int_to_ptr.vmem [resolvable:$true] %s133_s4 }
  0x8e   :  { %p1857_p9 = scmp.lt.u32.totalorder %s1853_s11, %s2228_s14 }
  0x90   :  { %p1859_p10 = pnand %p1857_p9, %p1854_p8 }
  0x92   :  { %1862 = shalt.err (!%p1859_p10)
}
  0x93   :  { %s1863_s29 = scalar_lea.vmem %s134_s4, 16  ;;  %s1867_s12 = scalar_lea.vmem %s134_s4, 32 }
  0x94   :  { %p1864_p11 = scmp.ne.s32.totalorder %s134_s4, %s1863_s29  ;;  %p1868_p12 = scmp.lt.s32.totalorder %s134_s4, %s134_s4 }
  0x95   :  { %p1869_p13 = scmp.lt.s32.totalorder %s1867_s12, %s1863_s29 }
  0x97   :  { %p1870_p0 = por %p1869_p13, %p1868_p12 }
  0x99   :  { %p1871_p1 = pnand %p1870_p0, %p1864_p11 }
  0x9b   :  { %1874 = shalt.err (!%p1871_p1)
}
  0x9c   :  { %136 = dma.hbm_to_vmem [thread:$0]  %s2228_s14, 16, %s134_s4, [#allocation14]  }
  0x9d   :  { %1875 = dma.done.wait [#allocation3], 320  }
  0x9e   :  { %1876 = vsyncadd [#allocation3], 4294966976 }
  0x9f   :  { %1877 = dma.done.wait [#allocation5], 6160  }
  0xa0   :  { %1878 = vsyncadd [#allocation5], 4294961136 }
  0xa1   :  { %1879 = dma.done.wait [#allocation8], 64  }
  0xa2   :  { %1880 = vsyncadd [#allocation8], 4294967232 }
  0xa3   :  { %1881 = dma.done.wait [#allocation11], 1056  }
  0xa4   :  { %1882 = vsyncadd [#allocation11], 4294966240 }
  0xa5   :  { %1883 = dma.done.wait [#allocation14], 2064  }
  0xa6   :  { %1884 = vsyncadd [#allocation14], 4294965232  ;;  %v1900_v0 = vmov 0   ;;  %v1901_v1 = vmov 0.0   ;;  %v167_v2 = vld [vmem:[%s2216_s2] sm:$0xff]  ;;  %vm188_vm0 = vcmask 1043456   ;;  %v168_v5 = vlaneseq }
  0xa7   :  { %1562 = vset.pattern.permute.xlu0 %v1900_v0  ;;  %1513 = vmatprep.subr.bf16.mxu1 %v1901_v1  ;;  %v183_v3 = vld [vmem:[#allocation2 + $0x10] sm:$0xf]  ;;  %vm1902_vm1 = vmmov 0   ;;  %vm184_vm3 = vcmask 64512   ;;  %v1563_v9 = vld [vmem:[#allocation2] sm:$0xff]   ;;  %v1564_v11 = vld [vmem:[#allocation2 + $0x8] sm:$0xff]  }
  0xa8   :  { %171 = vperm.xlu0 %1562, %v167_v2   ;;  %v190_v4 = vsel %vm188_vm0, %v183_v3, 0  ;;  %1515 = vmatprep.mubr.msk.bf16.mxu1 %vm1902_vm1, %v1901_v1  ;;  %v169_v6 = vand.u32 127, %v168_v5  ;;  %s2232_s3 = sld [smem:[#allocation21_spill]]  ;;  %vm244_vm4 = vcmask 261120   ;;  %v1366_v19 = vld [vmem:[#allocation4] ss:$0 sm:$0xff] }
  0xa9   :  { %1514 = vmatpush3.bf16.msra.mxu1 %v190_v4  ;;  %vm296_vm5 = vcmask 326656   ;;  %v320_v31 = vld [vmem:[%s2219_s5 + $0x20] sm:$0xff]  ;;  %s1903_s21 = smov 96   ;;  %v1578_v42 = vld [vmem:[#allocation6 + $0x18] ss:$12 sps:$4 sm:$0xff]   ;;  %vm1000_vm6 = vcmask 523264  }
  0xaa   :  { %1519 = vmatprep.subr.bf16.mxu1 %v1901_v1  ;;  %v1368_v32 = vcombine.high %v320_v31, %v320_v31  ;;  %v1367_v33 = vcombine.low %v320_v31, %v320_v31  ;;  %v1569_v36 = vld [vmem:[%s2219_s5 + $0x4] ss:$8 sps:$4 sm:$0xff]   ;;  %v1576_v41 = vld [vmem:[#allocation6 + $0x1c] ss:$12 sps:$4 sm:$0xff]  }
  0xab   :  { %v1573_v39 = vld [vmem:[#allocation6 + $0x4] ss:$12 sps:$4 sm:$0xff]   ;;  %v1575_v40 = vld [vmem:[#allocation6] ss:$12 sps:$4 sm:$0xff]   ;;  %v1584_v46 = vld [vmem:[#allocation6 + $0x48] ss:$12 sps:$4 sm:$0xff]  }
  0xac   :  { %v330_v34 = vsel %vm188_vm0, %v1367_v33, 0  ;;  %793 = vmatprep.subr.bf16.mxu0 %v1573_v39  ;;  %v1579_v43 = vld [vmem:[#allocation6 + $0x34] ss:$12 sps:$4 sm:$0xff]   ;;  %v1581_v44 = vld [vmem:[#allocation6 + $0x30] ss:$12 sps:$4 sm:$0xff]  }
  0xad   :  { %794 = vmatpush1.bf16.msra.mxu0 %v1575_v40  ;;  %v1582_v45 = vld [vmem:[#allocation6 + $0x4c] ss:$12 sps:$4 sm:$0xff]   ;;  %v1585_v47 = vld [vmem:[#allocation6 + $0x64] ss:$12 sps:$4 sm:$0xff]   ;;  %v1588_v49 = vld [vmem:[#allocation6 + $0x7c] ss:$12 sps:$4 sm:$0xff]  }
  0xae   :  { %v2118_v12 = vld [vmem:[%s2232_s3] sm:$0xff]  ;;  %795 = vmatprep.subr.bf16.mxu0 %v1576_v41  ;;  %v1590_v50 = vld [vmem:[#allocation6 + $0x78] ss:$12 sps:$4 sm:$0xff]   ;;  %v1591_v51 = vld [vmem:[#allocation6 + $0x94] ss:$12 sps:$4 sm:$0xff]  }
  0xaf   :  { %v2123_v13 = vpack.c.bf16 %v2118_v12, %v2118_v12  ;;  %v1587_v48 = vld [vmem:[#allocation6 + $0x60] ss:$12 sps:$4 sm:$0xff]   ;;  %v1593_v52 = vld [vmem:[#allocation6 + $0x90] ss:$12 sps:$4 sm:$0xff]   ;;  %v1596_v54 = vld [vmem:[#allocation6 + $0xa8] ss:$12 sps:$4 sm:$0xff]  }
  0xb0   :  { %v1594_v53 = vld [vmem:[#allocation6 + $0xac] ss:$12 sps:$4 sm:$0xff]   ;;  %v1598_v55 = vld [vmem:[#allocation6 + $0xc4] ss:$12 sps:$4 sm:$0xff]   ;;  %v1603_v57 = vld [vmem:[#allocation6 + $0xdc] ss:$12 sps:$4 sm:$0xff]  }
  0xb1   :  { %796 = vmatpush1.bf16.msra.mxu0 %v1578_v42  ;;  %v1601_v56 = vld [vmem:[#allocation6 + $0xc0] ss:$12 sps:$4 sm:$0xff]   ;;  %v1606_v58 = vld [vmem:[#allocation6 + $0xd8] ss:$12 sps:$4 sm:$0xff]   ;;  %v1611_v60 = vld [vmem:[#allocation6 + $0xf0] ss:$12 sps:$4 sm:$0xff]  }
  0xb2   :  { %797 = vmatprep.subr.bf16.mxu0 %v1579_v43  ;;  %v1608_v59 = vld [vmem:[#allocation6 + $0xf4] ss:$12 sps:$4 sm:$0xff]   ;;  %v1613_v61 = vld [vmem:[#allocation6 + $0x10c] ss:$12 sps:$4 sm:$0xff]   ;;  %v1631_v31 = vld [vmem:[#allocation6 + $0x150] ss:$12 sps:$4 sm:$0xff]  }
  0xb3   :  { %v1616_v62 = vld [vmem:[#allocation6 + $0x108] ss:$12 sps:$4 sm:$0xff]   ;;  %v1633_v33 = vld [vmem:[#allocation6 + $0x16c] ss:$12 sps:$4 sm:$0xff]  }
  0xb4   :  { %v1567_v3 = vld [vmem:[%s2219_s5] ss:$8 sps:$4 sm:$0xff]  }
  0xb5   :  { %798 = vmatpush1.bf16.msra.mxu0 %v1581_v44  ;;  %v440_v42 = vld [vmem:[%s2220_s6] sm:$0x3] }
  0xb6   :  { %799 = vmatprep.subr.bf16.mxu0 %v1582_v45 }
  0xb9   :  { %800 = vmatpush1.bf16.msra.mxu0 %v1584_v46 }
  0xba   :  { %801 = vmatprep.subr.bf16.mxu0 %v1585_v47 }
  0xbd   :  { %802 = vmatpush1.bf16.msra.mxu0 %v1587_v48 }
  0xbe   :  { %803 = vmatprep.subr.bf16.mxu0 %v1588_v49 }
  0xc1   :  { %804 = vmatpush1.bf16.msra.mxu0 %v1590_v50 }
  0xc2   :  { %805 = vmatprep.subr.bf16.mxu0 %v1591_v51 }
  0xc5   :  { %806 = vmatpush1.bf16.msra.mxu0 %v1593_v52 }
  0xc6   :  { %807 = vmatprep.subr.bf16.mxu0 %v1594_v53 }
  0xc9   :  { %808 = vmatpush1.bf16.msra.mxu0 %v1596_v54  ;;  %v1637_v54 = vld [vmem:[%s2223_s9 + $0x10] sm:$0xff]  }
  0xca   :  { %809 = vmatprep.subr.bf16.mxu0 %v1598_v55 }
  0xcd   :  { %810 = vmatpush1.bf16.msra.mxu0 %v1601_v56  ;;  %v1638_v56 = vld [vmem:[%s2223_s9 + $0x18] sm:$0xff]  }
  0xce   :  { %811 = vmatprep.subr.bf16.mxu0 %v1603_v57  ;;  %v2173_v57 = vld [vmem:[%s2215_s1] sm:$0xff] }
  0xd1   :  { %812 = vmatpush1.bf16.msra.mxu0 %v1606_v58  ;;  %v177_v58 = vpack.c.bf16 %v2173_v57, %v2173_v57 }
  0xd2   :  { %813 = vmatprep.subr.bf16.mxu0 %v1608_v59  ;;  %v1639_v59 = vld [vmem:[%s2223_s9] sm:$0xff]  }
  0xd5   :  { %814 = vmatpush1.bf16.msra.mxu0 %v1611_v60  ;;  %v1640_v60 = vld [vmem:[%s2223_s9 + $0x8] sm:$0xff]  }
  0xd6   :  { %815 = vmatprep.subr.bf16.mxu0 %v1613_v61  ;;  %v520_v61 = vld [vmem:[#allocation7] sm:$0x7] }
  0xd9   :  { %816 = vmatpush1.bf16.msra.mxu0 %v1616_v62 }
 0x127   :  { %v172_v7 = vpop.permute.xlu0 %171 }
 0x128   :  { %vm173_vm2 = vcmp.eq.s32.totalorder %v169_v6, %v172_v7  ;;  %v1572_v6 = vld [vmem:[%s2219_s5 + $0x14] ss:$8 sps:$4 sm:$0xff]   ;;  %v1570_v7 = vld [vmem:[%s2219_s5 + $0x10] ss:$8 sps:$4 sm:$0xff]  }
 0x129   :  { %v2108_v8 = vsel %vm173_vm2, 1.0, %v1901_v1 }
 0x12a   :  { %v178_v10 = vpack.c.bf16 %v2108_v8, %v2108_v8 }
 0x12c   :  { %1516 = vmatmul.mubr.msk.bf16.vlgmr.msra.gmra.mrb[0].mxu1 %vm184_vm3, %v178_v10  ;;  %v1600_v10 = vld [vmem:[#allocation6 + $0x8] ss:$12 sps:$4 sm:$0xff]  }
 0x12d   :  { %1520 = vmatpush3.bf16.msra.mxu1 %v1563_v9  ;;  %1523 = vmatprep.mubr.msk.bf16.mxu1 %vm1902_vm1, %v1901_v1  ;;  %v1597_v9 = vld [vmem:[#allocation6 + $0xc8] ss:$12 sps:$4 sm:$0xff]  }
 0x12e   :  { %1521 = vmatprep.subr.bf16.mxu1 %v1901_v1 }
 0x131   :  { %1522 = vmatpush3.bf16.msra.mxu1 %v1564_v11 }
 0x132   :  { %1369 = vmatprep.subr.msk.bf16.mxu1 %vm188_vm0, %v1368_v32  ;;  %v1632_v32 = vld [vmem:[#allocation6 + $0x170] ss:$12 sps:$4 sm:$0xff]  }
 0x134   :  { %1524 = vmatmul.mubr.msk.bf16.vlgmr.msra.gmra.mrb[4].mxu1 %vm244_vm4, %v2123_v13 }
 0x135   :  { %367 = vmatprep.mubr.bf16.mxu1 %v1900_v0  ;;  %336 = vmatpush1.bf16.msra.mxu1 %v330_v34  ;;  %v1635_v34 = vld [vmem:[#allocation6 + $0xb0] ss:$12 sps:$4 sm:$0xff]  }
 0x136   :  { %399 = vmatprep.subr.bf16.mxu1 %v1569_v36  ;;  %v443_v36 = vshrl.u32 %v168_v5, 7 }
 0x138   :  { %v2153_v41 = vsub.s32 0, %v443_v36  ;;  %v2158_v43 = vsub.s32 1, %v443_v36  ;;  %v532_v62 = vsub.s32 2, %v443_v36  ;;  %v1646_v36 = vld [vmem:[#allocation10 + $0x34] ss:$8 sps:$4 sm:$0xff]  }
 0x13a   :  { %v445_v44 = vrot.slane %v440_v42, %v2153_v41  ;;  %v449_v46 = vrot.slane %v440_v42, %v2158_v43 }
 0x1ff   :  { %v226_v14 = vpop.f32.mrb[0].mxu1 }
 0x200   :  { %v1517_v15 = vpop.f32.mrb[1].mxu1 }
 0x201   :  { %v229_v16 = vpop.f32.mrb[2].mxu1  ;;  %v1605_v15 = vld [vmem:[#allocation6 + $0x20] ss:$12 sps:$4 sm:$0xff]  }
 0x202   :  { %v1518_v17 = vpop.f32.mrb[3].mxu1  ;;  %v1607_v16 = vld [vmem:[#allocation6 + $0xf8] ss:$12 sps:$4 sm:$0xff]  }
 0x203   :  { %v1610_v17 = vld [vmem:[#allocation6 + $0x38] ss:$12 sps:$4 sm:$0xff]  }
 0x207   :  { %v282_v18 = vpop.f32.mrb[4].mxu1 }
 0x208   :  { %v283_v20 = vadd.f32 %v282_v18, %v226_v14  ;;  %v1525_v21 = vpop.f32.mrb[5].mxu1  ;;  %v1602_v14 = vld [vmem:[#allocation6 + $0xe0] ss:$12 sps:$4 sm:$0xff]   ;;  %v1612_v18 = vld [vmem:[#allocation6 + $0x110] ss:$12 sps:$4 sm:$0xff]  }
 0x209   :  { %v285_v22 = vpop.f32.mrb[6].mxu1  ;;  %v1618_v21 = vld [vmem:[#allocation6 + $0x124] ss:$12 sps:$4 sm:$0xff]  }
 0x20a   :  { %v1526_v23 = vpop.f32.mrb[7].mxu1  ;;  %v295_v24 = vadd.f32 %v1366_v19, %v283_v20  ;;  %v1615_v19 = vld [vmem:[#allocation6 + $0x50] ss:$12 sps:$4 sm:$0xff]   ;;  %v1617_v20 = vld [vmem:[#allocation6 + $0x128] ss:$12 sps:$4 sm:$0xff]   ;;  %817 = vmatprep.subr.bf16.mxu0 %v1618_v21 }
 0x20b   :  { %v1620_v22 = vld [vmem:[#allocation6 + $0x68] ss:$12 sps:$4 sm:$0xff]   ;;  %v1621_v23 = vld [vmem:[#allocation6 + $0x120] ss:$12 sps:$4 sm:$0xff]  }
 0x20c   :  { %v297_v25 = vsel %vm296_vm5, %v295_v24, -inf  ;;  %818 = vmatpush1.bf16.msra.mxu0 %v1621_v23 }
 0x20d   :  { %298 = vmax.xlane.f32.xlu0 %v297_v25  ;;  %v1623_v25 = vld [vmem:[#allocation6 + $0x13c] ss:$12 sps:$4 sm:$0xff]  }
 0x20e   :  { %819 = vmatprep.subr.bf16.mxu0 %v1623_v25 }
 0x29a   :  { %v299_v26 = vpop.xlane.xlu0 %298 }
 0x29b   :  { %v300_v27 = vsub.f32 %v295_v24, %v299_v26  ;;  %v1622_v24 = vld [vmem:[#allocation6 + $0x140] ss:$12 sps:$4 sm:$0xff]  }
 0x29c   :  { %v1625_v26 = vld [vmem:[#allocation6 + $0x80] ss:$12 sps:$4 sm:$0xff]  }
 0x29d   :  { %v301_v28 = vmul.f32 1.442695, %v300_v27  ;;  %v1626_v27 = vld [vmem:[#allocation6 + $0x138] ss:$12 sps:$4 sm:$0xff]  }
 0x29e   :  { %820 = vmatpush1.bf16.msra.mxu0 %v1626_v27 }
 0x29f   :  { %1669 = vpow2.f32 %v301_v28  ;;  %v1627_v28 = vld [vmem:[#allocation6 + $0x158] ss:$12 sps:$4 sm:$0xff]  }
 0x2a9   :  { %v1670_v29 = vpop.eup %1669 }
 0x2aa   :  { %v303_v30 = vsel %vm296_vm5, %v1670_v29, 0.0 }
 0x2ab   :  { %304 = vadd.xlane.f32.xlu1 %v303_v30  ;;  %v1630_v30 = vld [vmem:[#allocation6 + $0x98] ss:$12 sps:$4 sm:$0xff]  }
 0x338   :  { %v305_v35 = vpop.xlane.xlu1 %304 }
 0x339   :  { %1671 = vrcp.f32 %v305_v35  ;;  %v1636_v35 = vld [vmem:[#allocation6 + $0x168] ss:$12 sps:$4 sm:$0xff]  }
 0x343   :  { %v1672_v37 = vpop.eup %1671 }
 0x344   :  { %v307_v38 = vmul.f32 %v1672_v37, %v1670_v29  ;;  %v1628_v29 = vld [vmem:[#allocation6 + $0x154] ss:$12 sps:$4 sm:$0xff]  }
 0x345   :  { %821 = vmatprep.subr.bf16.mxu0 %v1628_v29 }
 0x346   :  { %311 = vrot.lane.b32.xlu1 %v307_v38, %s1903_s21  ;;  %822 = vmatpush1.bf16.msra.mxu0 %v1631_v31 }
 0x347   :  { %823 = vmatprep.subr.bf16.mxu0 %v1633_v33 }
 0x34a   :  { %824 = vmatpush1.bf16.msra.mxu0 %v1636_v35  ;;  %v1643_v35 = vld [vmem:[#allocation10 + $0x24] ss:$8 sps:$4 sm:$0xff]  }
 0x3b8   :  { %v312_v63 = vpop.permute.xlu1 %311 }
 0x3b9   :  { %v314_v2 = vmul.f32 %v2108_v8, %v312_v63  ;;  %v308_v8 = vmul.f32 %v307_v38, %v2118_v12  ;;  %v525_v63 = vrot.slane %v520_v61, %v2153_v41 }
 0x3bb   :  { %v315_v4 = vpack.c.bf16 %v314_v2, %v314_v2  ;;  %v309_v11 = vpack.c.bf16 %v308_v8, %v308_v8  ;;  %v529_v2 = vrot.slane %v520_v61, %v2158_v43 }
 0x3bd   :  { %1370 = vmatmul.mubr.msk.bf16.vlgmr.msra.gmra.mrb[8].mxu1 %vm184_vm3, %v315_v4 }
 0x3be   :  { %400 = vmatpush1.bf16.msra.mxu1 %v1567_v3  ;;  %431 = vmatprep.mubr.bf16.mxu1 %v1900_v0 }
 0x3bf   :  { %401 = vmatprep.subr.bf16.mxu1 %v1572_v6  ;;  %v533_v6 = vrot.slane %v520_v61, %v532_v62  ;;  %v1662_v61 = vld [vmem:[#allocation13 + $0x20] sm:$0xff]   ;;  %v1664_v62 = vld [vmem:[#allocation13 + $0x28] sm:$0xff]  }
 0x3c2   :  { %402 = vmatpush1.bf16.msra.mxu1 %v1570_v7 }
 0x3c3   :  { %1463 = vmatprep.subr.bf16.mxu1 %v1597_v9 }
 0x3c5   :  { %1375 = vmatmul.mubr.msk.bf16.vlgmr.msra.gmra.mrb[12].mxu1 %vm244_vm4, %v309_v11 }
 0x3c6   :  { %1464 = vmatpush3.bf16.msra.mxu1 %v1600_v10 }
 0x3c7   :  { %1465 = vmatprep.subr.bf16.mxu1 %v1602_v14 }
 0x3ca   :  { %1466 = vmatpush3.bf16.msra.mxu1 %v1605_v15 }
 0x3cb   :  { %1467 = vmatprep.subr.bf16.mxu1 %v1607_v16 }
 0x3ce   :  { %1468 = vmatpush3.bf16.msra.mxu1 %v1610_v17 }
 0x3cf   :  { %1469 = vmatprep.subr.bf16.mxu1 %v1612_v18 }
 0x3d2   :  { %1470 = vmatpush3.bf16.msra.mxu1 %v1615_v19 }
 0x3d3   :  { %1471 = vmatprep.subr.bf16.mxu1 %v1617_v20 }
 0x3d6   :  { %1472 = vmatpush3.bf16.msra.mxu1 %v1620_v22  ;;  %v1430_v22 = vld [vmem:[#allocation9] ss:$0 sm:$0xff] }
 0x3d7   :  { %1473 = vmatprep.subr.bf16.mxu1 %v1622_v24 }
 0x3da   :  { %1474 = vmatpush3.bf16.msra.mxu1 %v1625_v26 }
 0x3db   :  { %1475 = vmatprep.subr.bf16.mxu1 %v1627_v28 }
 0x3de   :  { %1476 = vmatpush3.bf16.msra.mxu1 %v1630_v30 }
 0x3df   :  { %1477 = vmatprep.subr.bf16.mxu1 %v1632_v32 }
 0x3e2   :  { %1478 = vmatpush3.bf16.msra.mxu1 %v1635_v34  ;;  %v1641_v34 = vld [vmem:[#allocation10 + $0x20] ss:$8 sps:$4 sm:$0xff]  }
 0x3e3   :  { %1527 = vmatprep.subr.bf16.mxu1 %v1901_v1 }
 0x490   :  { %v369_v37 = vpop.f32.mrb[8].mxu1 }
 0x491   :  { %v371_v38 = vpop.f32.mrb[9].mxu1 }
 0x492   :  { %v373_v39 = vpop.f32.mrb[10].mxu1 }
 0x493   :  { %v374_v40 = vpop.f32.mrb[11].mxu1  ;;  %v1649_v39 = vld [vmem:[#allocation10 + $0x4] ss:$8 sps:$4 sm:$0xff]  }
 0x498   :  { %v433_v45 = vpop.f32.mrb[12].mxu1 }
 0x499   :  { %v434_v47 = vadd.f32 %v433_v45, %v369_v37  ;;  %v435_v48 = vpop.f32.mrb[13].mxu1  ;;  %v1644_v37 = vld [vmem:[#allocation10 + $0x30] ss:$8 sps:$4 sm:$0xff]   ;;  %v1654_v45 = vld [vmem:[#allocation13] sm:$0xff]  }
 0x49a   :  { %v436_v5 = vadd.f32 %v435_v48, %v371_v38  ;;  %v437_v49 = vpop.f32.mrb[14].mxu1  ;;  %v1657_v48 = vld [vmem:[#allocation13 + $0x50] sm:$0xff]  }
 0x49b   :  { %v452_v50 = vadd.f32 %v445_v44, %v434_v47  ;;  %v438_v51 = vpop.f32.mrb[15].mxu1  ;;  %v1653_v44 = vld [vmem:[#allocation13 + $0x40] sm:$0xff]   ;;  %v1656_v47 = vld [vmem:[#allocation13 + $0x8] sm:$0xff]   ;;  %v1659_v49 = vld [vmem:[#allocation13 + $0x58] sm:$0xff]  }
 0x49c   :  { %v453_v52 = vadd.f32 %v449_v46, %v436_v5  ;;  %v1655_v46 = vld [vmem:[#allocation13 + $0x48] sm:$0xff]   ;;  %1491 = vmatprep.subr.bf16.mxu0 %v1653_v44  ;;  %v1658_v5 = vld [vmem:[#allocation13 + $0x10] sm:$0xff]  }
 0x49d   :  { %v454_v55 = vpack.c.bf16 %v452_v50, %v452_v50  ;;  %v1660_v50 = vld [vmem:[#allocation13 + $0x18] sm:$0xff]  }
 0x49e   :  { %v455_v53 = vpack.c.bf16 %v453_v52, %v453_v52 }
 0x4a0   :  { %825 = vmatprep.mubr.bf16.mxu0 %v455_v53  ;;  %866 = vmatprep.mubr.bf16.mxu1 %v455_v53  ;;  %v1647_v53 = vld [vmem:[#allocation10] ss:$8 sps:$4 sm:$0xff]  }
 0x4a1   :  { %826 = vmatmul.mubr.bf16.vlgmr.msra.gmra.mrb[0].mxu0 %v454_v55  ;;  %867 = vmatmul.mubr.bf16.vlgmr.msra.gmra.mrb[16].mxu1 %v454_v55  ;;  %v1652_v55 = vld [vmem:[#allocation10 + $0x14] ss:$8 sps:$4 sm:$0xff]  }
 0x4a2   :  { %1528 = vmatpush3.bf16.msra.mxu1 %v1637_v54  ;;  %1531 = vmatprep.mubr.msk.bf16.mxu1 %vm1902_vm1, %v1901_v1 }
 0x4a3   :  { %1529 = vmatprep.subr.bf16.mxu1 %v1901_v1  ;;  %1492 = vmatpush3.bf16.msra.mxu0 %v1654_v45 }
 0x4a4   :  { %1493 = vmatprep.subr.bf16.mxu0 %v1655_v46 }
 0x4a6   :  { %1530 = vmatpush3.bf16.msra.mxu1 %v1638_v56  ;;  %v1650_v56 = vld [vmem:[#allocation10 + $0x10] ss:$8 sps:$4 sm:$0xff]  }
 0x4a7   :  { %1535 = vmatprep.subr.bf16.mxu1 %v1901_v1  ;;  %1494 = vmatpush3.bf16.msra.mxu0 %v1656_v47 }
 0x4a8   :  { %1495 = vmatprep.subr.bf16.mxu0 %v1657_v48 }
 0x4a9   :  { %1532 = vmatmul.mubr.msk.bf16.vlgmr.msra.gmra.mrb[20].mxu1 %vm244_vm4, %v177_v58 }
 0x4aa   :  { %1536 = vmatpush3.bf16.msra.mxu1 %v1639_v59  ;;  %1539 = vmatprep.mubr.msk.bf16.mxu1 %vm1902_vm1, %v1901_v1 }
 0x4ab   :  { %1537 = vmatprep.subr.bf16.mxu1 %v1901_v1  ;;  %1496 = vmatpush3.bf16.msra.mxu0 %v1658_v5 }
 0x4ac   :  { %1497 = vmatprep.subr.bf16.mxu0 %v1659_v49 }
 0x4ae   :  { %1538 = vmatpush3.bf16.msra.mxu1 %v1640_v60  ;;  %v1661_v60 = vld [vmem:[#allocation13 + $0x60] sm:$0xff]  }
 0x4af   :  { %1051 = vmatprep.subr.bf16.mxu1 %v1643_v35  ;;  %1498 = vmatpush3.bf16.msra.mxu0 %v1660_v50 }
 0x4b0   :  { %1499 = vmatprep.subr.bf16.mxu0 %v1661_v60 }
 0x4b1   :  { %1540 = vmatmul.mubr.msk.bf16.vlgmr.msra.gmra.mrb[24].mxu1 %vm244_vm4, %v2123_v13 }
 0x4b2   :  { %1083 = vmatprep.mubr.bf16.mxu1 %v1900_v0  ;;  %1052 = vmatpush1.bf16.msra.mxu1 %v1641_v34 }
 0x4b3   :  { %1053 = vmatprep.subr.bf16.mxu1 %v1646_v36  ;;  %1500 = vmatpush3.bf16.msra.mxu0 %v1662_v61 }
 0x4b6   :  { %1054 = vmatpush1.bf16.msra.mxu1 %v1644_v37 }
 0x4b7   :  { %1115 = vmatprep.subr.bf16.mxu1 %v1649_v39 }
 0x574   :  { %v827_v3 = vpop.f32.mrb[0].mxu0  ;;  %v1479_v4 = vpop.f32.mrb[16].mxu1 }
 0x575   :  { %v828_v7 = vadd.f32 %v827_v3, %v525_v63  ;;  %v829_v8 = vpop.f32.mrb[1].mxu0  ;;  %v1480_v9 = vpop.f32.mrb[17].mxu1  ;;  %v1665_v63 = vld [vmem:[#allocation13 + $0x70] sm:$0xff]   ;;  %v1668_v3 = vld [vmem:[#allocation13 + $0x38] sm:$0xff]  }
 0x576   :  { %v830_v10 = vadd.f32 %v829_v8, %v529_v2  ;;  %v1481_v1 = vadd.f32 %v1480_v9, %v1479_v4  ;;  %v831_v11 = vpop.f32.mrb[2].mxu0  ;;  %v1482_v14 = vpop.f32.mrb[18].mxu1  ;;  %v1666_v2 = vld [vmem:[#allocation13 + $0x30] sm:$0xff]   ;;  %v1156_v8 = vld [vmem:[#allocation12] sm:$0x3] }
 0x577   :  { %874 = vst [vmem:[%s2229_s15] sm:$0xff] %v828_v7  ;;  %v832_v13 = vpop.f32.mrb[3].mxu0  ;;  %v1483_v15 = vpop.f32.mrb[19].mxu1  ;;  %v1161_v9 = vrot.slane %v1156_v8, %v2153_v41 }
 0x578   :  { %875 = vst [vmem:[%s2229_s15 + $0x8] sm:$0xff] %v830_v10  ;;  %v869_v16 = vadd.f32 %v1481_v1, %v533_v6  ;;  %v1165_v1 = vrot.slane %v1156_v8, %v2158_v43 }
 0x57a   :  { %876 = vst [vmem:[%s2229_s15 + $0x10] sm:$0xff] %v869_v16 }
 0x57c   :  { %v934_v17 = vpop.f32.mrb[20].mxu1 }
 0x57d   :  { %v1533_v18 = vpop.f32.mrb[21].mxu1 }
 0x57e   :  { %v937_v19 = vpop.f32.mrb[22].mxu1 }
 0x57f   :  { %v1534_v20 = vpop.f32.mrb[23].mxu1 }
 0x584   :  { %v986_v21 = vpop.f32.mrb[24].mxu1 }
 0x585   :  { %v987_v23 = vadd.f32 %v986_v21, %v934_v17  ;;  %v1541_v24 = vpop.f32.mrb[25].mxu1 }
 0x586   :  { %v989_v25 = vpop.f32.mrb[26].mxu1 }
 0x587   :  { %v1542_v26 = vpop.f32.mrb[27].mxu1  ;;  %v999_v27 = vadd.f32 %v1430_v22, %v987_v23  ;;  %v1441_v22 = vld [vmem:[#allocation15] ss:$0 sm:$0xff] }
 0x589   :  { %v1001_v28 = vsel %vm1000_vm6, %v999_v27, -inf }
 0x58a   :  { %1002 = vmax.xlane.f32.xlu1 %v1001_v28 }
 0x617   :  { %v1003_v29 = vpop.xlane.xlu1 %1002 }
 0x618   :  { %v1004_v30 = vsub.f32 %v999_v27, %v1003_v29 }
 0x61a   :  { %v1005_v31 = vmul.f32 1.442695, %v1004_v30 }
 0x61c   :  { %1673 = vpow2.f32 %v1005_v31 }
 0x626   :  { %v1674_v32 = vpop.eup %1673 }
 0x627   :  { %v1007_v33 = vsel %vm1000_vm6, %v1674_v32, 0.0 }
 0x628   :  { %1008 = vadd.xlane.f32.xlu0 %v1007_v33 }
 0x6b5   :  { %v1009_v38 = vpop.xlane.xlu0 %1008 }
 0x6b6   :  { %1675 = vrcp.f32 %v1009_v38 }
 0x6c0   :  { %v1676_v40 = vpop.eup %1675 }
 0x6c1   :  { %v1011_v42 = vmul.f32 %v1676_v40, %v1674_v32 }
 0x6c3   :  { %1015 = vrot.lane.b32.xlu0 %v1011_v42, %s1903_s21  ;;  %v1012_v58 = vmul.f32 %v1011_v42, %v2118_v12 }
 0x6c5   :  { %v1013_v59 = vpack.c.bf16 %v1012_v58, %v1012_v58 }
 0x735   :  { %v1016_v51 = vpop.permute.xlu0 %1015 }
 0x736   :  { %v1018_v52 = vmul.f32 %v1016_v51, %v2173_v57  ;;  %v1663_v57 = vld [vmem:[#allocation13 + $0x68] sm:$0xff]  }
 0x737   :  { %1501 = vmatprep.subr.bf16.mxu0 %v1663_v57 }
 0x738   :  { %v1019_v54 = vpack.c.bf16 %v1018_v52, %v1018_v52  ;;  %1502 = vmatpush3.bf16.msra.mxu0 %v1664_v62 }
 0x739   :  { %1503 = vmatprep.subr.bf16.mxu0 %v1665_v63 }
 0x73a   :  { %1435 = vmatmul.mubr.msk.bf16.vlgmr.msra.gmra.mrb[28].mxu1 %vm244_vm4, %v1019_v54 }
 0x73b   :  { %1116 = vmatpush1.bf16.msra.mxu1 %v1647_v53  ;;  %1147 = vmatprep.mubr.bf16.mxu1 %v1900_v0  ;;  %v1667_v0 = vld [vmem:[#allocation13 + $0x78] sm:$0xff]  }
 0x73c   :  { %1117 = vmatprep.subr.bf16.mxu1 %v1652_v55  ;;  %1504 = vmatpush3.bf16.msra.mxu0 %v1666_v2 }
 0x73d   :  { %1505 = vmatprep.subr.bf16.mxu0 %v1667_v0 }
 0x73f   :  { %1118 = vmatpush1.bf16.msra.mxu1 %v1650_v56 }
 0x740   :  { %1506 = vmatpush3.bf16.msra.mxu0 %v1668_v3 }
 0x742   :  { %1440 = vmatmul.mubr.msk.bf16.vlgmr.msra.gmra.mrb[32].mxu1 %vm244_vm4, %v1013_v59 }
 0x80d   :  { %v1085_v12 = vpop.f32.mrb[28].mxu1 }
 0x80e   :  { %v1087_v4 = vpop.f32.mrb[29].mxu1 }
 0x80f   :  { %v1089_v6 = vpop.f32.mrb[30].mxu1 }
 0x810   :  { %v1090_v7 = vpop.f32.mrb[31].mxu1 }
 0x815   :  { %v1149_v10 = vpop.f32.mrb[32].mxu1 }
 0x816   :  { %v1150_v11 = vadd.f32 %v1149_v10, %v1085_v12  ;;  %v1151_v14 = vpop.f32.mrb[33].mxu1 }
 0x817   :  { %v1152_v13 = vadd.f32 %v1151_v14, %v1087_v4  ;;  %v1153_v15 = vpop.f32.mrb[34].mxu1 }
 0x818   :  { %v1168_v16 = vadd.f32 %v1161_v9, %v1150_v11  ;;  %v1154_v17 = vpop.f32.mrb[35].mxu1 }
 0x819   :  { %v1169_v18 = vadd.f32 %v1165_v1, %v1152_v13 }
 0x81a   :  { %v1170_v20 = vpack.c.bf16 %v1168_v16, %v1168_v16 }
 0x81b   :  { %v1171_v19 = vpack.c.bf16 %v1169_v18, %v1169_v18 }
 0x81d   :  { %1339 = vmatprep.mubr.bf16.mxu0 %v1171_v19 }
 0x81e   :  { %1340 = vmatmul.mubr.bf16.vlgmr.msra.gmra.mrb[4].mxu0 %v1170_v20 }
 0x8f1   :  { %v1507_v21 = vpop.f32.mrb[4].mxu0 }
 0x8f2   :  { %v1508_v23 = vpop.f32.mrb[5].mxu0 }
 0x8f3   :  { %v1509_v24 = vadd.f32 %v1508_v23, %v1507_v21  ;;  %v1510_v25 = vpop.f32.mrb[6].mxu0 }
 0x8f4   :  { %v1511_v41 = vpop.f32.mrb[7].mxu0 }
 0x8f5   :  { %v1342_v26 = vadd.f32 %v1509_v24, %v1441_v22 }
 0x8f7   :  { %1347 = vst [vmem:[%s2230_s16] sm:$0xff] %v1342_v26 }
 0x8f8   :  { %1356 = vsyncpa [#allocation3], 1 }
 0x8f9   :  { %1357 = vsyncpa [#allocation5], 1 }
 0x8fa   :  { %1358 = vsyncpa [#allocation8], 1 }
 0x8fb   :  { %1359 = vsyncpa [#allocation11], 1 }
 0x8fc   :  { %1360 = vsyncpa [#allocation14], 1 }

</bundles_post_ra>
